<compile_context>
chip_gen: v6e
topology: v6e:2x2x1
jax: 0.10.0
libtpu: 0.0.40
codegen_flags: <defaults>
</compile_context>

<pallas_src>
import functools
import re

import jax
import jax.numpy as jnp
from jax import lax
from jax.experimental import pallas as pl
from jax.experimental.pallas import tpu as pltpu

NEG_SLOPE = 0.2        # torch_geometric GATConv default LeakyReLU slope
MASK_VALUE = -1e30     # additive mask for non-edges
_FUSED_MAX_N = 512     # below this node count the whole model runs in ONE pallas_call


# --------------------------------------------------------------------------
# Hardware-aware configuration
# --------------------------------------------------------------------------
def _tpu_generation():
    try:
        kind = jax.devices()[0].device_kind.lower()
    except Exception:
        return 6
    m = re.search(r"(\d+)", kind)
    return int(m.group(1)) if m else 6


def _vmem_limit_bytes(gen):
    try:
        cap = pltpu.get_tpu_info().vmem_capacity_bytes
    except Exception:
        cap = (64 if gen >= 7 else 128) * 1024 * 1024
    # leave headroom for double buffers / internal scratch
    return int(cap) * 3 // 4


def _exp_dtype(gen):
    # bf16 EUP exists on v6e/v7x; v5e (and older) has no bf16 transcendentals.
    return jnp.bfloat16 if gen >= 6 else jnp.float32


def _round_up(n, m):
    return ((n + m - 1) // m) * m


def _plan_tiles(n, gen, max_tile=None):
    """Pick (tile, padded_n): tile is a multiple of 128 dividing padded_n."""
    cap = 256 if gen >= 7 else 512          # v7x: only 64 MiB VMEM -> smaller tiles
    if max_tile is not None:
        cap = min(cap, max_tile)
    cap = max(128, cap - cap % 128)
    n_pad = _round_up(n, 128)
    if n_pad <= cap:
        return n_pad, n_pad
    t = cap
    while n_pad % t:
        t -= 128
    return t, n_pad


def _resident_spec(shape):
    """Full-array block with a constant index map (1-D grid)."""
    zeros = (0,) * len(shape)
    return pl.BlockSpec(shape, lambda i: zeros)


# --------------------------------------------------------------------------
# Pallas kernels
# --------------------------------------------------------------------------
def _gat_project_kernel(h_ref, w_ref, wh_ref):
    """WH = H @ W, bf16 in / f32 acc / bf16 out, one MXU pass per node tile."""
    wh_ref[...] = jnp.dot(h_ref[...].astype(jnp.bfloat16), w_ref[...],
                          preferred_element_type=jnp.float32).astype(wh_ref.dtype)


def _gat_flash_attn_kernel(adjb_ref, whd_ref, whs_ref, amat_srcT_ref, amat_dst_ref,
                           bias_ref, out_ref, m_scr, l_scr, acc_scr,
                           *, heads, f_out, exp_dtype):
    """Masked multi-head attention with online (flash) softmax over src tiles.

    Grid = (dst_tiles [parallel], src_tiles [arbitrary]).
    adjb_ref : [TD, TS]  bf16 additive mask (0 edge / -1e30 non-edge)
    whd_ref  : [TD, hf]  bf16 projected features of the destination tile
    whs_ref  : [TS, hf]  bf16 projected features of the source tile
    amat_*   : tiny block-diagonal attention matrices (resident, bf16)
    out_ref  : [TD, hf]  f32, written once at the last src step
    """
    s = pl.program_id(1)

    @pl.when(s == 0)
    def _init():
        m_scr[...] = jnp.full(m_scr.shape, MASK_VALUE, jnp.float32)
        l_scr[...] = jnp.zeros_like(l_scr)
        acc_scr[...] = jnp.zeros_like(acc_scr)

    mask = adjb_ref[...].astype(jnp.float32)            # [TD, TS]
    wh_d = whd_ref[...]                                 # [TD, hf] bf16
    wh_s = whs_ref[...]                                 # [TS, hf] bf16

    # Per-node logits, recomputed in-kernel (tiny MXU work, no HBM round trip,
    # no host transpose): a_dst[i,h] = att_dst[h].Wh_d[i,h];  a_src_t[h,j] likewise.
    a_dst = jnp.dot(wh_d, amat_dst_ref[...],
                    preferred_element_type=jnp.float32)                   # [TD, H]
    a_src_t = lax.dot_general(amat_srcT_ref[...], wh_s,
                              (((1,), (1,)), ((), ())),
                              preferred_element_type=jnp.float32)         # [H, TS]

    for hh in range(heads):
        e = a_dst[:, hh:hh + 1] + a_src_t[hh:hh + 1, :]                   # [TD, TS]
        e = jnp.where(e > 0, e, NEG_SLOPE * e) + mask                     # LeakyReLU + mask
        m_prev = m_scr[:, hh:hh + 1]
        m_new = jnp.maximum(m_prev, jnp.max(e, axis=-1, keepdims=True))
        corr = jnp.exp(m_prev - m_new)
        p = jnp.exp((e - m_new).astype(exp_dtype))                        # bf16 EUP on v6e/v7x
        l_scr[:, hh:hh + 1] = corr * l_scr[:, hh:hh + 1] + jnp.sum(
            p.astype(jnp.float32), axis=-1, keepdims=True)
        acc_scr[:, hh * f_out:(hh + 1) * f_out] = (
            corr * acc_scr[:, hh * f_out:(hh + 1) * f_out]
            + jnp.dot(p.astype(jnp.bfloat16), wh_s[:, hh * f_out:(hh + 1) * f_out],
                      preferred_element_type=jnp.float32))
        m_scr[:, hh:hh + 1] = m_new

    @pl.when(s == pl.num_programs(1) - 1)
    def _finalize():
        cols = [acc_scr[:, hh * f_out:(hh + 1) * f_out]
                * pl.reciprocal(l_scr[:, hh:hh + 1], approx=True)         # EUP slot
                for hh in range(heads)]
        y = jnp.concatenate(cols, axis=-1) + bias_ref[...]
        out_ref[...] = jnp.maximum(y, 0.0).astype(out_ref.dtype)          # fused F.relu


def _dual_decoder_kernel(*refs, n2, n3):
    """Both decoders fused; single lane-dense output slab [TILE, d2+d3]."""
    x_ref = refs[0]
    prefs = refs[1:1 + 2 * (n2 + n3)]
    out_ref = refs[-1]
    x = x_ref[...].astype(jnp.float32)

    def mlp(h, ps):
        for li in range(len(ps) // 2):
            w = ps[2 * li][...]                                   # bf16 weights
            b = ps[2 * li + 1][...].astype(jnp.float32)
            h = jnp.maximum(jnp.dot(h.astype(jnp.bfloat16), w,
                                    preferred_element_type=jnp.float32) + b, 0.0)
        return h

    d2 = mlp(x, prefs[:2 * n2])
    d3 = mlp(x, prefs[2 * n2:])
    out_ref[...] = jnp.concatenate([d2, d3], axis=-1).astype(out_ref.dtype)


def _fused_model_kernel(*refs, n_enc, heads, n2, n3, exp_dtype):
    """Whole model (all GATConv layers + both decoders) in ONE kernel.

    Used for small graphs where per-launch and HBM round-trip overhead
    dominates. refs = (adj_bias, H, [W, amat_srcT, amat_dst, bias]*n_enc,
                       [W, b]*(n2+n3), h_out, dec_out)
    """
    adjb_ref, h_ref = refs[0], refs[1]
    k = 2
    enc_refs = [tuple(refs[k + 4 * i: k + 4 * i + 4]) for i in range(n_enc)]
    k += 4 * n_enc
    dec_refs = refs[k:k + 2 * (n2 + n3)]
    h_out_ref = refs[k + 2 * (n2 + n3)]
    dec_out_ref = refs[k + 2 * (n2 + n3) + 1]

    mask = adjb_ref[...].astype(jnp.float32)           # [N, N], reused by every layer
    h = h_ref[...].astype(jnp.bfloat16)
    y = None
    for (w_ref, amat_srcT_ref, amat_dst_ref, b_ref) in enc_refs:
        hf = w_ref.shape[1]
        f_out = hf // heads
        wh = jnp.dot(h, w_ref[...], preferred_element_type=jnp.float32)   # [N, hf]
        wh_bf = wh.astype(jnp.bfloat16)
        a_dst = jnp.dot(wh_bf, amat_dst_ref[...],
                        preferred_element_type=jnp.float32)               # [N, H]
        a_src_t = lax.dot_general(amat_srcT_ref[...], wh_bf,
                                  (((1,), (1,)), ((), ())),
                                  preferred_element_type=jnp.float32)     # [H, N]
        outs = []
        for hh in range(heads):
            e = a_dst[:, hh:hh + 1] + a_src_t[hh:hh + 1, :]
            e = jnp.where(e > 0, e, NEG_SLOPE * e) + mask
            m = jnp.max(e, axis=-1, keepdims=True)
            p = jnp.exp((e - m).astype(exp_dtype))
            denom = jnp.sum(p.astype(jnp.float32), axis=-1, keepdims=True)
            num = jnp.dot(p.astype(jnp.bfloat16), wh_bf[:, hh * f_out:(hh + 1) * f_out],
                          preferred_element_type=jnp.float32)
            outs.append(num * pl.reciprocal(denom, approx=True))
        y = jnp.maximum(jnp.concatenate(outs, axis=-1) + b_ref[...], 0.0)  # bias + relu
        h = y.astype(jnp.bfloat16)

    h_out_ref[...] = y.astype(h_out_ref.dtype)

    def mlp(x, ps):
        for li in range(len(ps) // 2):
            w = ps[2 * li][...]
            b = ps[2 * li + 1][...].astype(jnp.float32)
            x = jnp.maximum(jnp.dot(x.astype(jnp.bfloat16), w,
                                    preferred_element_type=jnp.float32) + b, 0.0)
        return x

    d2 = mlp(y, dec_refs[:2 * n2])
    d3 = mlp(y, dec_refs[2 * n2:])
    dec_out_ref[...] = jnp.concatenate([d2, d3], axis=-1).astype(dec_out_ref.dtype)


# --------------------------------------------------------------------------
# Wrappers
# --------------------------------------------------------------------------
def _att_matrices(att_src, att_dst):
    """Block-diagonal attention matrices (bf16).

    amat_srcT[h, h*f+f'] = att_src[h, f']   (used as q@k.T against WH)
    amat_dst [h*f+f', h] = att_dst[h, f']   (used as WH @ amat_dst)
    """
    heads, f_out = att_src.shape
    eye = jnp.eye(heads, dtype=jnp.float32)
    amat_dst = (att_dst[:, :, None] * eye[:, None, :]).reshape(heads * f_out, heads)
    amat_srcT = (eye[:, :, None] * att_src[None, :, :]).reshape(heads, heads * f_out)
    return amat_srcT.astype(jnp.bfloat16), amat_dst.astype(jnp.bfloat16)


def _build_adj_bias(n_pad, n_real, edge_index):
    """Additive attention-mask bias, built directly in bf16 (no f32 N^2 temp)."""
    ii = jnp.arange(n_real, dtype=edge_index.dtype)
    rows = jnp.concatenate([edge_index[1], ii])   # destination i
    cols = jnp.concatenate([edge_index[0], ii])   # source j  (self loops added)
    bias = jnp.full((n_pad, n_pad), MASK_VALUE, dtype=jnp.bfloat16)
    return bias.at[rows, cols].set(0.0)


def _prepare_params(params):
    enc = []
    for lp in params["enc"]:
        _, f_out = lp["att_src"].shape
        amat_srcT, amat_dst = _att_matrices(lp["att_src"], lp["att_dst"])
        enc.append(dict(W=lp["W"].astype(jnp.bfloat16), amat_srcT=amat_srcT,
                        amat_dst=amat_dst, bias=lp["bias"], f_out=f_out))
    dec = [(p["W"].astype(jnp.bfloat16), p["b"])
           for p in list(params["dec2"]) + list(params["dec3"])]
    return enc, dec


def gat_conv_tiled(Hp, W, amat_srcT, amat_dst, bias, adj_bias, *,
                   heads, f_out, tile, exp_dtype, vmem_limit):
    """One GATConv layer: tiled projection + flash-softmax attention."""
    Np, f_in = Hp.shape
    hf = heads * f_out
    n_tiles = Np // tile

    wh = pl.pallas_call(
        _gat_project_kernel,
        out_shape=jax.ShapeDtypeStruct((Np, hf), jnp.bfloat16),
        grid=(n_tiles,),
        in_specs=[pl.BlockSpec((tile, f_in), lambda i: (i, 0)),
                  _resident_spec(W.shape)],
        out_specs=pl.BlockSpec((tile, hf), lambda i: (i, 0)),
        compiler_params=pltpu.CompilerParams(
            dimension_semantics=("parallel",), vmem_limit_bytes=vmem_limit),
    )(Hp, W)

    kernel = functools.partial(_gat_flash_attn_kernel, heads=heads, f_out=f_out,
                               exp_dtype=exp_dtype)
    # dst axis "parallel" (megacore on v7x), src axis last + "arbitrary" (reduction).
    # TODO(synk): for production, pad hf to a multiple of 128 for fully lane-dense
    # stores, and consider pipeline_mode=pl.Buffered(3) on adj if its DMA is exposed.
    return pl.pallas_call(
        kernel,
        out_shape=jax.ShapeDtypeStruct((Np, hf), jnp.float32),
        grid=(n_tiles, n_tiles),
        in_specs=[pl.BlockSpec((tile, tile), lambda d, s: (d, s)),   # adj bias (bf16)
                  pl.BlockSpec((tile, hf), lambda d, s: (d, 0)),     # WH dst tile
                  pl.BlockSpec((tile, hf), lambda d, s: (s, 0)),     # WH src tile
                  pl.BlockSpec((heads, hf), lambda d, s: (0, 0)),    # amat_srcT
                  pl.BlockSpec((hf, heads), lambda d, s: (0, 0)),    # amat_dst
                  pl.BlockSpec((1, hf), lambda d, s: (0, 0))],       # bias
        out_specs=pl.BlockSpec((tile, hf), lambda d, s: (d, 0)),
        scratch_shapes=[pltpu.VMEM((tile, heads), jnp.float32),      # running max
                        pltpu.VMEM((tile, heads), jnp.float32),      # running denom
                        pltpu.VMEM((tile, hf), jnp.float32)],        # running numerator
        compiler_params=pltpu.CompilerParams(
            dimension_semantics=("parallel", "arbitrary"),
            vmem_limit_bytes=vmem_limit),
    )(adj_bias, wh, wh, amat_srcT, amat_dst, bias)


def dual_decoder_tiled(Hp, dec, n2, n3, *, tile, vmem_limit):
    Np, f_in = Hp.shape
    d2_dim = dec[n2 - 1][0].shape[1]
    d3_dim = dec[-1][0].shape[1]
    d_total = d2_dim + d3_dim

    flat = []
    in_specs = [pl.BlockSpec((tile, f_in), lambda i: (i, 0))]
    for (w, b) in dec:
        flat += [w, b]
        in_specs += [_resident_spec(w.shape), _resident_spec(b.shape)]

    kernel = functools.partial(_dual_decoder_kernel, n2=n2, n3=n3)
    return pl.pallas_call(
        kernel,
        out_shape=jax.ShapeDtypeStruct((Np, d_total), jnp.float32),
        grid=(Np // tile,),
        in_specs=in_specs,
        out_specs=pl.BlockSpec((tile, d_total), lambda i: (i, 0)),
        compiler_params=pltpu.CompilerParams(
            dimension_semantics=("parallel",), vmem_limit_bytes=vmem_limit),
    )(Hp, *flat)


def _fused_forward(H, adj_bias, enc, dec, *, heads, n2, n3, exp_dtype, vmem_limit):
    N = H.shape[0]
    hf_last = enc[-1]["W"].shape[1]
    d2_dim = dec[n2 - 1][0].shape[1]
    d3_dim = dec[-1][0].shape[1]

    inputs = [adj_bias, H]
    for lp in enc:
        inputs += [lp["W"], lp["amat_srcT"], lp["amat_dst"], lp["bias"]]
    for (w, b) in dec:
        inputs += [w, b]
    in_specs = [_resident_spec(x.shape) for x in inputs]

    kernel = functools.partial(_fused_model_kernel, n_enc=len(enc), heads=heads,
                               n2=n2, n3=n3, exp_dtype=exp_dtype)
    # TODO(synk): single grid point -> one TensorCore on v7x; fine at this size.
    return pl.pallas_call(
        kernel,
        out_shape=(jax.ShapeDtypeStruct((N, hf_last), jnp.float32),
                   jax.ShapeDtypeStruct((N, d2_dim + d3_dim), jnp.float32)),
        grid=(1,),
        in_specs=in_specs,
        out_specs=(_resident_spec((N, hf_last)),
                   _resident_spec((N, d2_dim + d3_dim))),
        compiler_params=pltpu.CompilerParams(
            dimension_semantics=("arbitrary",), vmem_limit_bytes=vmem_limit),
    )(*inputs)


# --------------------------------------------------------------------------
# Parameter construction (deterministic, synthetic)
# --------------------------------------------------------------------------
def make_gat_params(key, in_dim, out_dim, heads):
    k1, k2, k3 = jax.random.split(key, 3)
    scale = 1.0 / jnp.sqrt(jnp.float32(in_dim))
    W = jax.random.normal(k1, (in_dim, heads * out_dim), jnp.float32) * scale
    att_src = jax.random.normal(k2, (heads, out_dim), jnp.float32) * 0.1
    att_dst = jax.random.normal(k3, (heads, out_dim), jnp.float32) * 0.1
    bias = jnp.zeros((1, heads * out_dim), jnp.float32)
    return dict(W=W, att_src=att_src, att_dst=att_dst, bias=bias)


def make_linear_params(key, in_dim, out_dim):
    k1, k2 = jax.random.split(key)
    scale = 1.0 / jnp.sqrt(jnp.float32(in_dim))
    W = jax.random.normal(k1, (in_dim, out_dim), jnp.float32) * scale
    b = jax.random.normal(k2, (1, out_dim), jnp.float32) * scale
    return dict(W=W, b=b)


def make_decoder_params(key, input_dim, hidden_dim, out_dim, layer):
    params = []
    keys = jax.random.split(key, layer)
    for i in range(layer):
        if layer > 1:
            if i == 0:
                dims = (input_dim, hidden_dim)
            elif i == layer - 1:
                dims = (hidden_dim, out_dim)
            else:
                dims = (hidden_dim, hidden_dim)
        else:
            dims = (input_dim, out_dim)
        params.append(make_linear_params(keys[i], *dims))
    return params


def make_gat_model_params(key, channel, input_dim, hidden_dim, out_dim,
                          dec2_dim, dec3_dim, enc_layer, dec_layer):
    keys = jax.random.split(key, enc_layer + 2)
    enc = []
    for i in range(enc_layer):
        if i == 0:
            dims = (input_dim, hidden_dim)
        elif i == enc_layer - 1:
            dims = (hidden_dim * channel, out_dim)
        else:
            dims = (hidden_dim * channel, hidden_dim)
        enc.append(make_gat_params(keys[i], dims[0], dims[1], channel))
    dec2 = make_decoder_params(keys[enc_layer], out_dim * channel, hidden_dim,
                               dec2_dim, dec_layer)
    dec3 = make_decoder_params(keys[enc_layer + 1], out_dim * channel, hidden_dim,
                               dec3_dim, dec_layer)
    return dict(enc=enc, dec2=dec2, dec3=dec3, channel=channel)


# --------------------------------------------------------------------------
# Model forward (mirrors GAT.forward: ReLU after every GATConv, two decoders)
# --------------------------------------------------------------------------
def gat_forward(params, H, edge_index, *, use_fused=None, max_tile=None):
    N = H.shape[0]
    heads = params["channel"]
    gen = _tpu_generation()
    exp_dtype = _exp_dtype(gen)
    vmem_limit = _vmem_limit_bytes(gen)

    n2 = len(params["dec2"])
    n3 = len(params["dec3"])
    d2_dim = params["dec2"][-1]["W"].shape[1]
    d3_dim = params["dec3"][-1]["W"].shape[1]
    enc, dec = _prepare_params(params)

    if use_fused is None:
        use_fused = N <= _FUSED_MAX_N

    if use_fused:
        adj_bias = _build_adj_bias(N, N, edge_index)
        h_out, dec_out = _fused_forward(H, adj_bias, enc, dec, heads=heads,
                                        n2=n2, n3=n3, exp_dtype=exp_dtype,
                                        vmem_limit=vmem_limit)
        return h_out, h_out, dec_out[:, :d2_dim], dec_out[:, d2_dim:]

    # Tiled / flash path: pad N up to a multiple of the tile; padded rows are
    # fully masked sources (adj bias -1e30) so they never pollute real rows.
    tile, Np = _plan_tiles(N, gen, max_tile)
    adj_bias = _build_adj_bias(Np, N, edge_index)
    Hp = jnp.pad(H, ((0, Np - N), (0, 0))) if Np != N else H

    for lp in enc:
        Hp = gat_conv_tiled(Hp, lp["W"], lp["amat_srcT"], lp["amat_dst"],
                            lp["bias"], adj_bias, heads=heads, f_out=lp["f_out"],
                            tile=tile, exp_dtype=exp_dtype, vmem_limit=vmem_limit)

    dec_out = dual_decoder_tiled(Hp, dec, n2, n3, tile=tile, vmem_limit=vmem_limit)
    H_final = Hp[:N]
    return H_final, H_final, dec_out[:N, :d2_dim], dec_out[:N, d2_dim:]


# --------------------------------------------------------------------------
# Main
# --------------------------------------------------------------------------
if __name__ == "__main__":
    # Small, forward-consistent shapes
    N = 16            # number of graph nodes
    channel = 2       # attention heads
    input_dim = 8
    hidden_dim = 8
    out_dim = 8
    dec2_dim = 4
    dec3_dim = 6
    enc_layer = 2
    dec_layer = 2

    key = jax.random.PRNGKey(0)
    k_param, k_h, k_h2 = jax.random.split(key, 3)

    params = make_gat_model_params(k_param, channel, input_dim, hidden_dim,
                                   out_dim, dec2_dim, dec3_dim,
                                   enc_layer, dec_layer)

    # Node features + deterministic bidirectional ring graph
    H = jax.random.normal(k_h, (N, input_dim), jnp.float32)
    src = jnp.arange(N, dtype=jnp.int32)
    dst = (src + 1) % N
    edge_index = jnp.stack([jnp.concatenate([src, dst]),
                            jnp.concatenate([dst, src])], axis=0)  # [2, 2N]

    # 1) Small graph -> fully fused single-kernel path.
    h1, h2, d2, d3 = gat_forward(params, H, edge_index)
    jax.block_until_ready((h1, h2, d2, d3))
    assert h1.shape == (N, out_dim * channel)
    assert h2.shape == (N, out_dim * channel)
    assert d2.shape == (N, dec2_dim)
    assert d3.shape == (N, dec3_dim)
    assert bool(jnp.all(jnp.isfinite(h1)))
    assert bool(jnp.all(jnp.isfinite(d2))) and bool(jnp.all(jnp.isfinite(d3)))

    # 2) Larger graph -> tiled projection + flash-softmax attention path
    #    (max_tile=128 forces a multi-step online-softmax reduction).
    N2 = 256
    H2 = jax.random.normal(k_h2, (N2, input_dim), jnp.float32)
    src2 = jnp.arange(N2, dtype=jnp.int32)
    dst2 = (src2 + 1) % N2
    edge_index2 = jnp.stack([jnp.concatenate([src2, dst2]),
                             jnp.concatenate([dst2, src2])], axis=0)
    g1, g2, e2, e3 = gat_forward(params, H2, edge_index2,
                                 use_fused=False, max_tile=128)
    jax.block_until_ready((g1, e2, e3))
    assert g1.shape == (N2, out_dim * channel)
    assert e2.shape == (N2, dec2_dim)
    assert e3.shape == (N2, dec3_dim)
    assert bool(jnp.all(jnp.isfinite(g1)))
    assert bool(jnp.all(jnp.isfinite(e2))) and bool(jnp.all(jnp.isfinite(e3)))

    print("KERNEL_OK")
</pallas_src>

<mosaic_0001>
module attributes {stable_mosaic.version = 11 : i64} {
  func.func @_fused_model_kernel(%arg0: i32, %arg1: memref<16x16xbf16, #tpu.memory_space<vmem>>, %arg2: memref<16x8xf32, #tpu.memory_space<vmem>>, %arg3: memref<8x16xbf16, #tpu.memory_space<vmem>>, %arg4: memref<2x16xbf16, #tpu.memory_space<vmem>>, %arg5: memref<16x2xbf16, #tpu.memory_space<vmem>>, %arg6: memref<1x16xf32, #tpu.memory_space<vmem>>, %arg7: memref<16x16xbf16, #tpu.memory_space<vmem>>, %arg8: memref<2x16xbf16, #tpu.memory_space<vmem>>, %arg9: memref<16x2xbf16, #tpu.memory_space<vmem>>, %arg10: memref<1x16xf32, #tpu.memory_space<vmem>>, %arg11: memref<16x8xbf16, #tpu.memory_space<vmem>>, %arg12: memref<1x8xf32, #tpu.memory_space<vmem>>, %arg13: memref<8x4xbf16, #tpu.memory_space<vmem>>, %arg14: memref<1x4xf32, #tpu.memory_space<vmem>>, %arg15: memref<16x8xbf16, #tpu.memory_space<vmem>>, %arg16: memref<1x8xf32, #tpu.memory_space<vmem>>, %arg17: memref<8x6xbf16, #tpu.memory_space<vmem>>, %arg18: memref<1x6xf32, #tpu.memory_space<vmem>>, %arg19: memref<16x16xf32, #tpu.memory_space<vmem>>, %arg20: memref<16x10xf32, #tpu.memory_space<vmem>>) attributes {dimension_semantics = [#tpu.dimension_semantics<arbitrary>], iteration_bounds = array<i64: 1>, scalar_prefetch = 0 : i64, scratch_operands = 0 : i64, tpu.core_type = #tpu.core_type<tc>, window_params = [{pipeline_mode = #tpu.pipeline_mode<synchronous>, transform_indices = @transform_0, window_bounds = array<i64: 16, 16>}, {pipeline_mode = #tpu.pipeline_mode<synchronous>, transform_indices = @transform_1, window_bounds = array<i64: 16, 8>}, {pipeline_mode = #tpu.pipeline_mode<synchronous>, transform_indices = @transform_2, window_bounds = array<i64: 8, 16>}, {pipeline_mode = #tpu.pipeline_mode<synchronous>, transform_indices = @transform_3, window_bounds = array<i64: 2, 16>}, {pipeline_mode = #tpu.pipeline_mode<synchronous>, transform_indices = @transform_4, window_bounds = array<i64: 16, 2>}, {pipeline_mode = #tpu.pipeline_mode<synchronous>, transform_indices = @transform_5, window_bounds = array<i64: 1, 16>}, {pipeline_mode = #tpu.pipeline_mode<synchronous>, transform_indices = @transform_6, window_bounds = array<i64: 16, 16>}, {pipeline_mode = #tpu.pipeline_mode<synchronous>, transform_indices = @transform_7, window_bounds = array<i64: 2, 16>}, {pipeline_mode = #tpu.pipeline_mode<synchronous>, transform_indices = @transform_8, window_bounds = array<i64: 16, 2>}, {pipeline_mode = #tpu.pipeline_mode<synchronous>, transform_indices = @transform_9, window_bounds = array<i64: 1, 16>}, {pipeline_mode = #tpu.pipeline_mode<synchronous>, transform_indices = @transform_10, window_bounds = array<i64: 16, 8>}, {pipeline_mode = #tpu.pipeline_mode<synchronous>, transform_indices = @transform_11, window_bounds = array<i64: 1, 8>}, {pipeline_mode = #tpu.pipeline_mode<synchronous>, transform_indices = @transform_12, window_bounds = array<i64: 8, 4>}, {pipeline_mode = #tpu.pipeline_mode<synchronous>, transform_indices = @transform_13, window_bounds = array<i64: 1, 4>}, {pipeline_mode = #tpu.pipeline_mode<synchronous>, transform_indices = @transform_14, window_bounds = array<i64: 16, 8>}, {pipeline_mode = #tpu.pipeline_mode<synchronous>, transform_indices = @transform_15, window_bounds = array<i64: 1, 8>}, {pipeline_mode = #tpu.pipeline_mode<synchronous>, transform_indices = @transform_16, window_bounds = array<i64: 8, 6>}, {pipeline_mode = #tpu.pipeline_mode<synchronous>, transform_indices = @transform_17, window_bounds = array<i64: 1, 6>}, {pipeline_mode = #tpu.pipeline_mode<synchronous>, transform_indices = @transform_18, window_bounds = array<i64: 16, 16>}, {pipeline_mode = #tpu.pipeline_mode<synchronous>, transform_indices = @transform_19, window_bounds = array<i64: 16, 10>}]} {
    %c0 = arith.constant 0 : index
    %c0_0 = arith.constant 0 : index
    %0 = vector.load %arg1[%c0, %c0_0] : memref<16x16xbf16, #tpu.memory_space<vmem>>, vector<16x16xbf16>
    %1 = arith.extf %0 : vector<16x16xbf16> to vector<16x16xf32>
    %c0_1 = arith.constant 0 : index
    %c0_2 = arith.constant 0 : index
    %2 = vector.load %arg2[%c0_1, %c0_2] : memref<16x8xf32, #tpu.memory_space<vmem>>, vector<16x8xf32>
    %3 = arith.truncf %2 : vector<16x8xf32> to vector<16x8xbf16>
    %c0_3 = arith.constant 0 : index
    %c0_4 = arith.constant 0 : index
    %4 = vector.load %arg3[%c0_3, %c0_4] : memref<8x16xbf16, #tpu.memory_space<vmem>>, vector<8x16xbf16>
    %cst = arith.constant dense<0.000000e+00> : vector<16x16xf32>
    %5 = tpu.matmul %3, %4, %cst {dimension_numbers = #tpu.dot_dimension_numbers<[1], [0], [0], [1], [0, 0, 1, 1], [], []>} : vector<16x8xbf16>, vector<8x16xbf16>, vector<16x16xf32> -> vector<16x16xf32>
    %6 = arith.truncf %5 : vector<16x16xf32> to vector<16x16xbf16>
    %c0_5 = arith.constant 0 : index
    %c0_6 = arith.constant 0 : index
    %7 = vector.load %arg5[%c0_5, %c0_6] : memref<16x2xbf16, #tpu.memory_space<vmem>>, vector<16x2xbf16>
    %cst_7 = arith.constant dense<0.000000e+00> : vector<16x2xf32>
    %8 = tpu.matmul %6, %7, %cst_7 {dimension_numbers = #tpu.dot_dimension_numbers<[1], [0], [0], [1], [0, 0, 1, 1], [], []>} : vector<16x16xbf16>, vector<16x2xbf16>, vector<16x2xf32> -> vector<16x2xf32>
    %c0_8 = arith.constant 0 : index
    %c0_9 = arith.constant 0 : index
    %9 = vector.load %arg4[%c0_8, %c0_9] : memref<2x16xbf16, #tpu.memory_space<vmem>>, vector<2x16xbf16>
    %cst_10 = arith.constant dense<0.000000e+00> : vector<2x16xf32>
    %10 = tpu.matmul %9, %6, %cst_10 {dimension_numbers = #tpu.dot_dimension_numbers<[1], [1], [0], [0], [0, 0, 1, 0], [], []>} : vector<2x16xbf16>, vector<16x16xbf16>, vector<2x16xf32> -> vector<2x16xf32>
    %11 = vector.extract_strided_slice %8 {offsets = [0, 0], sizes = [16, 1], strides = [1, 1]} : vector<16x2xf32> to vector<16x1xf32>
    %12 = vector.extract_strided_slice %10 {offsets = [0, 0], sizes = [1, 16], strides = [1, 1]} : vector<2x16xf32> to vector<1x16xf32>
    %13 = vector.broadcast %11 : vector<16x1xf32> to vector<16x16xf32>
    %14 = vector.broadcast %12 : vector<1x16xf32> to vector<16x16xf32>
    %15 = arith.addf %13, %14 : vector<16x16xf32>
    %cst_11 = arith.constant 0.000000e+00 : f32
    %16 = vector.broadcast %cst_11 : f32 to vector<16x16xf32>
    %17 = arith.cmpf ogt, %15, %16 : vector<16x16xf32>
    %cst_12 = arith.constant 2.000000e-01 : f32
    %18 = vector.broadcast %cst_12 : f32 to vector<16x16xf32>
    %19 = arith.mulf %18, %15 : vector<16x16xf32>
    %20 = arith.select %17, %15, %19 : vector<16x16xi1>, vector<16x16xf32>
    %21 = arith.addf %20, %1 : vector<16x16xf32>
    %cst_13 = arith.constant dense<0xFF800000> : vector<16xf32>
    %22 = vector.multi_reduction <maximumf>, %21, %cst_13 [1] : vector<16x16xf32> to vector<16xf32>
    %23 = vector.shape_cast %22 : vector<16xf32> to vector<16x1xf32>
    %24 = vector.broadcast %23 : vector<16x1xf32> to vector<16x16xf32>
    %25 = arith.subf %21, %24 : vector<16x16xf32>
    %26 = arith.truncf %25 : vector<16x16xf32> to vector<16x16xbf16>
    %27 = math.exp %26 : vector<16x16xbf16>
    %28 = arith.extf %27 : vector<16x16xbf16> to vector<16x16xf32>
    %cst_14 = arith.constant dense<0.000000e+00> : vector<16xf32>
    %29 = vector.multi_reduction <add>, %28, %cst_14 [1] : vector<16x16xf32> to vector<16xf32>
    %30 = vector.shape_cast %29 : vector<16xf32> to vector<16x1xf32>
    %31 = vector.extract_strided_slice %6 {offsets = [0, 0], sizes = [16, 8], strides = [1, 1]} : vector<16x16xbf16> to vector<16x8xbf16>
    %cst_15 = arith.constant dense<0.000000e+00> : vector<16x8xf32>
    %32 = tpu.matmul %27, %31, %cst_15 {dimension_numbers = #tpu.dot_dimension_numbers<[1], [0], [0], [1], [0, 0, 1, 1], [], []>} : vector<16x16xbf16>, vector<16x8xbf16>, vector<16x8xf32> -> vector<16x8xf32>
    %33 = tpu.reciprocal %30 {approx = true} : vector<16x1xf32> -> vector<16x1xf32>
    %34 = vector.broadcast %33 : vector<16x1xf32> to vector<16x8xf32>
    %35 = arith.mulf %32, %34 : vector<16x8xf32>
    %36 = vector.extract_strided_slice %8 {offsets = [0, 1], sizes = [16, 1], strides = [1, 1]} : vector<16x2xf32> to vector<16x1xf32>
    %37 = vector.extract_strided_slice %10 {offsets = [1, 0], sizes = [1, 16], strides = [1, 1]} : vector<2x16xf32> to vector<1x16xf32>
    %38 = vector.broadcast %36 : vector<16x1xf32> to vector<16x16xf32>
    %39 = vector.broadcast %37 : vector<1x16xf32> to vector<16x16xf32>
    %40 = arith.addf %38, %39 : vector<16x16xf32>
    %cst_16 = arith.constant 0.000000e+00 : f32
    %41 = vector.broadcast %cst_16 : f32 to vector<16x16xf32>
    %42 = arith.cmpf ogt, %40, %41 : vector<16x16xf32>
    %cst_17 = arith.constant 2.000000e-01 : f32
    %43 = vector.broadcast %cst_17 : f32 to vector<16x16xf32>
    %44 = arith.mulf %43, %40 : vector<16x16xf32>
    %45 = arith.select %42, %40, %44 : vector<16x16xi1>, vector<16x16xf32>
    %46 = arith.addf %45, %1 : vector<16x16xf32>
    %cst_18 = arith.constant dense<0xFF800000> : vector<16xf32>
    %47 = vector.multi_reduction <maximumf>, %46, %cst_18 [1] : vector<16x16xf32> to vector<16xf32>
    %48 = vector.shape_cast %47 : vector<16xf32> to vector<16x1xf32>
    %49 = vector.broadcast %48 : vector<16x1xf32> to vector<16x16xf32>
    %50 = arith.subf %46, %49 : vector<16x16xf32>
    %51 = arith.truncf %50 : vector<16x16xf32> to vector<16x16xbf16>
    %52 = math.exp %51 : vector<16x16xbf16>
    %53 = arith.extf %52 : vector<16x16xbf16> to vector<16x16xf32>
    %cst_19 = arith.constant dense<0.000000e+00> : vector<16xf32>
    %54 = vector.multi_reduction <add>, %53, %cst_19 [1] : vector<16x16xf32> to vector<16xf32>
    %55 = vector.shape_cast %54 : vector<16xf32> to vector<16x1xf32>
    %56 = vector.extract_strided_slice %6 {offsets = [0, 8], sizes = [16, 8], strides = [1, 1]} : vector<16x16xbf16> to vector<16x8xbf16>
    %cst_20 = arith.constant dense<0.000000e+00> : vector<16x8xf32>
    %57 = tpu.matmul %52, %56, %cst_20 {dimension_numbers = #tpu.dot_dimension_numbers<[1], [0], [0], [1], [0, 0, 1, 1], [], []>} : vector<16x16xbf16>, vector<16x8xbf16>, vector<16x8xf32> -> vector<16x8xf32>
    %58 = tpu.reciprocal %55 {approx = true} : vector<16x1xf32> -> vector<16x1xf32>
    %59 = vector.broadcast %58 : vector<16x1xf32> to vector<16x8xf32>
    %60 = arith.mulf %57, %59 : vector<16x8xf32>
    %61 = tpu.concatenate %35, %60 in 1 : vector<16x8xf32>, vector<16x8xf32> -> vector<16x16xf32>
    %c0_21 = arith.constant 0 : index
    %c0_22 = arith.constant 0 : index
    %62 = vector.load %arg6[%c0_21, %c0_22] : memref<1x16xf32, #tpu.memory_space<vmem>>, vector<1x16xf32>
    %63 = vector.broadcast %62 : vector<1x16xf32> to vector<16x16xf32>
    %64 = arith.addf %61, %63 : vector<16x16xf32>
    %cst_23 = arith.constant 0.000000e+00 : f32
    %65 = vector.broadcast %cst_23 : f32 to vector<16x16xf32>
    %66 = arith.maximumf %64, %65 : vector<16x16xf32>
    %67 = arith.truncf %66 : vector<16x16xf32> to vector<16x16xbf16>
    %c0_24 = arith.constant 0 : index
    %c0_25 = arith.constant 0 : index
    %68 = vector.load %arg7[%c0_24, %c0_25] : memref<16x16xbf16, #tpu.memory_space<vmem>>, vector<16x16xbf16>
    %cst_26 = arith.constant dense<0.000000e+00> : vector<16x16xf32>
    %69 = tpu.matmul %67, %68, %cst_26 {dimension_numbers = #tpu.dot_dimension_numbers<[1], [0], [0], [1], [0, 0, 1, 1], [], []>} : vector<16x16xbf16>, vector<16x16xbf16>, vector<16x16xf32> -> vector<16x16xf32>
    %70 = arith.truncf %69 : vector<16x16xf32> to vector<16x16xbf16>
    %c0_27 = arith.constant 0 : index
    %c0_28 = arith.constant 0 : index
    %71 = vector.load %arg9[%c0_27, %c0_28] : memref<16x2xbf16, #tpu.memory_space<vmem>>, vector<16x2xbf16>
    %cst_29 = arith.constant dense<0.000000e+00> : vector<16x2xf32>
    %72 = tpu.matmul %70, %71, %cst_29 {dimension_numbers = #tpu.dot_dimension_numbers<[1], [0], [0], [1], [0, 0, 1, 1], [], []>} : vector<16x16xbf16>, vector<16x2xbf16>, vector<16x2xf32> -> vector<16x2xf32>
    %c0_30 = arith.constant 0 : index
    %c0_31 = arith.constant 0 : index
    %73 = vector.load %arg8[%c0_30, %c0_31] : memref<2x16xbf16, #tpu.memory_space<vmem>>, vector<2x16xbf16>
    %cst_32 = arith.constant dense<0.000000e+00> : vector<2x16xf32>
    %74 = tpu.matmul %73, %70, %cst_32 {dimension_numbers = #tpu.dot_dimension_numbers<[1], [1], [0], [0], [0, 0, 1, 0], [], []>} : vector<2x16xbf16>, vector<16x16xbf16>, vector<2x16xf32> -> vector<2x16xf32>
    %75 = vector.extract_strided_slice %72 {offsets = [0, 0], sizes = [16, 1], strides = [1, 1]} : vector<16x2xf32> to vector<16x1xf32>
    %76 = vector.extract_strided_slice %74 {offsets = [0, 0], sizes = [1, 16], strides = [1, 1]} : vector<2x16xf32> to vector<1x16xf32>
    %77 = vector.broadcast %75 : vector<16x1xf32> to vector<16x16xf32>
    %78 = vector.broadcast %76 : vector<1x16xf32> to vector<16x16xf32>
    %79 = arith.addf %77, %78 : vector<16x16xf32>
    %cst_33 = arith.constant 0.000000e+00 : f32
    %80 = vector.broadcast %cst_33 : f32 to vector<16x16xf32>
    %81 = arith.cmpf ogt, %79, %80 : vector<16x16xf32>
    %cst_34 = arith.constant 2.000000e-01 : f32
    %82 = vector.broadcast %cst_34 : f32 to vector<16x16xf32>
    %83 = arith.mulf %82, %79 : vector<16x16xf32>
    %84 = arith.select %81, %79, %83 : vector<16x16xi1>, vector<16x16xf32>
    %85 = arith.addf %84, %1 : vector<16x16xf32>
    %cst_35 = arith.constant dense<0xFF800000> : vector<16xf32>
    %86 = vector.multi_reduction <maximumf>, %85, %cst_35 [1] : vector<16x16xf32> to vector<16xf32>
    %87 = vector.shape_cast %86 : vector<16xf32> to vector<16x1xf32>
    %88 = vector.broadcast %87 : vector<16x1xf32> to vector<16x16xf32>
    %89 = arith.subf %85, %88 : vector<16x16xf32>
    %90 = arith.truncf %89 : vector<16x16xf32> to vector<16x16xbf16>
    %91 = math.exp %90 : vector<16x16xbf16>
    %92 = arith.extf %91 : vector<16x16xbf16> to vector<16x16xf32>
    %cst_36 = arith.constant dense<0.000000e+00> : vector<16xf32>
    %93 = vector.multi_reduction <add>, %92, %cst_36 [1] : vector<16x16xf32> to vector<16xf32>
    %94 = vector.shape_cast %93 : vector<16xf32> to vector<16x1xf32>
    %95 = vector.extract_strided_slice %70 {offsets = [0, 0], sizes = [16, 8], strides = [1, 1]} : vector<16x16xbf16> to vector<16x8xbf16>
    %cst_37 = arith.constant dense<0.000000e+00> : vector<16x8xf32>
    %96 = tpu.matmul %91, %95, %cst_37 {dimension_numbers = #tpu.dot_dimension_numbers<[1], [0], [0], [1], [0, 0, 1, 1], [], []>} : vector<16x16xbf16>, vector<16x8xbf16>, vector<16x8xf32> -> vector<16x8xf32>
    %97 = tpu.reciprocal %94 {approx = true} : vector<16x1xf32> -> vector<16x1xf32>
    %98 = vector.broadcast %97 : vector<16x1xf32> to vector<16x8xf32>
    %99 = arith.mulf %96, %98 : vector<16x8xf32>
    %100 = vector.extract_strided_slice %72 {offsets = [0, 1], sizes = [16, 1], strides = [1, 1]} : vector<16x2xf32> to vector<16x1xf32>
    %101 = vector.extract_strided_slice %74 {offsets = [1, 0], sizes = [1, 16], strides = [1, 1]} : vector<2x16xf32> to vector<1x16xf32>
    %102 = vector.broadcast %100 : vector<16x1xf32> to vector<16x16xf32>
    %103 = vector.broadcast %101 : vector<1x16xf32> to vector<16x16xf32>
    %104 = arith.addf %102, %103 : vector<16x16xf32>
    %cst_38 = arith.constant 0.000000e+00 : f32
    %105 = vector.broadcast %cst_38 : f32 to vector<16x16xf32>
    %106 = arith.cmpf ogt, %104, %105 : vector<16x16xf32>
    %cst_39 = arith.constant 2.000000e-01 : f32
    %107 = vector.broadcast %cst_39 : f32 to vector<16x16xf32>
    %108 = arith.mulf %107, %104 : vector<16x16xf32>
    %109 = arith.select %106, %104, %108 : vector<16x16xi1>, vector<16x16xf32>
    %110 = arith.addf %109, %1 : vector<16x16xf32>
    %cst_40 = arith.constant dense<0xFF800000> : vector<16xf32>
    %111 = vector.multi_reduction <maximumf>, %110, %cst_40 [1] : vector<16x16xf32> to vector<16xf32>
    %112 = vector.shape_cast %111 : vector<16xf32> to vector<16x1xf32>
    %113 = vector.broadcast %112 : vector<16x1xf32> to vector<16x16xf32>
    %114 = arith.subf %110, %113 : vector<16x16xf32>
    %115 = arith.truncf %114 : vector<16x16xf32> to vector<16x16xbf16>
    %116 = math.exp %115 : vector<16x16xbf16>
    %117 = arith.extf %116 : vector<16x16xbf16> to vector<16x16xf32>
    %cst_41 = arith.constant dense<0.000000e+00> : vector<16xf32>
    %118 = vector.multi_reduction <add>, %117, %cst_41 [1] : vector<16x16xf32> to vector<16xf32>
    %119 = vector.shape_cast %118 : vector<16xf32> to vector<16x1xf32>
    %120 = vector.extract_strided_slice %70 {offsets = [0, 8], sizes = [16, 8], strides = [1, 1]} : vector<16x16xbf16> to vector<16x8xbf16>
    %cst_42 = arith.constant dense<0.000000e+00> : vector<16x8xf32>
    %121 = tpu.matmul %116, %120, %cst_42 {dimension_numbers = #tpu.dot_dimension_numbers<[1], [0], [0], [1], [0, 0, 1, 1], [], []>} : vector<16x16xbf16>, vector<16x8xbf16>, vector<16x8xf32> -> vector<16x8xf32>
    %122 = tpu.reciprocal %119 {approx = true} : vector<16x1xf32> -> vector<16x1xf32>
    %123 = vector.broadcast %122 : vector<16x1xf32> to vector<16x8xf32>
    %124 = arith.mulf %121, %123 : vector<16x8xf32>
    %125 = tpu.concatenate %99, %124 in 1 : vector<16x8xf32>, vector<16x8xf32> -> vector<16x16xf32>
    %c0_43 = arith.constant 0 : index
    %c0_44 = arith.constant 0 : index
    %126 = vector.load %arg10[%c0_43, %c0_44] : memref<1x16xf32, #tpu.memory_space<vmem>>, vector<1x16xf32>
    %127 = vector.broadcast %126 : vector<1x16xf32> to vector<16x16xf32>
    %128 = arith.addf %125, %127 : vector<16x16xf32>
    %cst_45 = arith.constant 0.000000e+00 : f32
    %129 = vector.broadcast %cst_45 : f32 to vector<16x16xf32>
    %130 = arith.maximumf %128, %129 : vector<16x16xf32>
    %c0_46 = arith.constant 0 : index
    %c0_47 = arith.constant 0 : index
    %131 = vector.load %arg19[%c0_46, %c0_47] : memref<16x16xf32, #tpu.memory_space<vmem>>, vector<16x16xf32>
    tpu.vector_store %arg19[%c0_46, %c0_47], %130 {strides = array<i32>} : memref<16x16xf32, #tpu.memory_space<vmem>>, vector<16x16xf32>,
    %c0_48 = arith.constant 0 : index
    %c0_49 = arith.constant 0 : index
    %132 = vector.load %arg11[%c0_48, %c0_49] : memref<16x8xbf16, #tpu.memory_space<vmem>>, vector<16x8xbf16>
    %c0_50 = arith.constant 0 : index
    %c0_51 = arith.constant 0 : index
    %133 = vector.load %arg12[%c0_50, %c0_51] : memref<1x8xf32, #tpu.memory_space<vmem>>, vector<1x8xf32>
    %134 = arith.truncf %130 : vector<16x16xf32> to vector<16x16xbf16>
    %cst_52 = arith.constant dense<0.000000e+00> : vector<16x8xf32>
    %135 = tpu.matmul %134, %132, %cst_52 {dimension_numbers = #tpu.dot_dimension_numbers<[1], [0], [0], [1], [0, 0, 1, 1], [], []>} : vector<16x16xbf16>, vector<16x8xbf16>, vector<16x8xf32> -> vector<16x8xf32>
    %136 = vector.broadcast %133 : vector<1x8xf32> to vector<16x8xf32>
    %137 = arith.addf %135, %136 : vector<16x8xf32>
    %cst_53 = arith.constant 0.000000e+00 : f32
    %138 = vector.broadcast %cst_53 : f32 to vector<16x8xf32>
    %139 = arith.maximumf %137, %138 : vector<16x8xf32>
    %c0_54 = arith.constant 0 : index
    %c0_55 = arith.constant 0 : index
    %140 = vector.load %arg13[%c0_54, %c0_55] : memref<8x4xbf16, #tpu.memory_space<vmem>>, vector<8x4xbf16>
    %c0_56 = arith.constant 0 : index
    %c0_57 = arith.constant 0 : index
    %141 = vector.load %arg14[%c0_56, %c0_57] : memref<1x4xf32, #tpu.memory_space<vmem>>, vector<1x4xf32>
    %142 = arith.truncf %139 : vector<16x8xf32> to vector<16x8xbf16>
    %cst_58 = arith.constant dense<0.000000e+00> : vector<16x4xf32>
    %143 = tpu.matmul %142, %140, %cst_58 {dimension_numbers = #tpu.dot_dimension_numbers<[1], [0], [0], [1], [0, 0, 1, 1], [], []>} : vector<16x8xbf16>, vector<8x4xbf16>, vector<16x4xf32> -> vector<16x4xf32>
    %144 = vector.broadcast %141 : vector<1x4xf32> to vector<16x4xf32>
    %145 = arith.addf %143, %144 : vector<16x4xf32>
    %cst_59 = arith.constant 0.000000e+00 : f32
    %146 = vector.broadcast %cst_59 : f32 to vector<16x4xf32>
    %147 = arith.maximumf %145, %146 : vector<16x4xf32>
    %c0_60 = arith.constant 0 : index
    %c0_61 = arith.constant 0 : index
    %148 = vector.load %arg15[%c0_60, %c0_61] : memref<16x8xbf16, #tpu.memory_space<vmem>>, vector<16x8xbf16>
    %c0_62 = arith.constant 0 : index
    %c0_63 = arith.constant 0 : index
    %149 = vector.load %arg16[%c0_62, %c0_63] : memref<1x8xf32, #tpu.memory_space<vmem>>, vector<1x8xf32>
    %150 = arith.truncf %130 : vector<16x16xf32> to vector<16x16xbf16>
    %cst_64 = arith.constant dense<0.000000e+00> : vector<16x8xf32>
    %151 = tpu.matmul %150, %148, %cst_64 {dimension_numbers = #tpu.dot_dimension_numbers<[1], [0], [0], [1], [0, 0, 1, 1], [], []>} : vector<16x16xbf16>, vector<16x8xbf16>, vector<16x8xf32> -> vector<16x8xf32>
    %152 = vector.broadcast %149 : vector<1x8xf32> to vector<16x8xf32>
    %153 = arith.addf %151, %152 : vector<16x8xf32>
    %cst_65 = arith.constant 0.000000e+00 : f32
    %154 = vector.broadcast %cst_65 : f32 to vector<16x8xf32>
    %155 = arith.maximumf %153, %154 : vector<16x8xf32>
    %c0_66 = arith.constant 0 : index
    %c0_67 = arith.constant 0 : index
    %156 = vector.load %arg17[%c0_66, %c0_67] : memref<8x6xbf16, #tpu.memory_space<vmem>>, vector<8x6xbf16>
    %c0_68 = arith.constant 0 : index
    %c0_69 = arith.constant 0 : index
    %157 = vector.load %arg18[%c0_68, %c0_69] : memref<1x6xf32, #tpu.memory_space<vmem>>, vector<1x6xf32>
    %158 = arith.truncf %155 : vector<16x8xf32> to vector<16x8xbf16>
    %cst_70 = arith.constant dense<0.000000e+00> : vector<16x6xf32>
    %159 = tpu.matmul %158, %156, %cst_70 {dimension_numbers = #tpu.dot_dimension_numbers<[1], [0], [0], [1], [0, 0, 1, 1], [], []>} : vector<16x8xbf16>, vector<8x6xbf16>, vector<16x6xf32> -> vector<16x6xf32>
    %160 = vector.broadcast %157 : vector<1x6xf32> to vector<16x6xf32>
    %161 = arith.addf %159, %160 : vector<16x6xf32>
    %cst_71 = arith.constant 0.000000e+00 : f32
    %162 = vector.broadcast %cst_71 : f32 to vector<16x6xf32>
    %163 = arith.maximumf %161, %162 : vector<16x6xf32>
    %164 = tpu.concatenate %147, %163 in 1 : vector<16x4xf32>, vector<16x6xf32> -> vector<16x10xf32>
    %c0_72 = arith.constant 0 : index
    %c0_73 = arith.constant 0 : index
    %165 = vector.load %arg20[%c0_72, %c0_73] : memref<16x10xf32, #tpu.memory_space<vmem>>, vector<16x10xf32>
    tpu.vector_store %arg20[%c0_72, %c0_73], %164 {strides = array<i32>} : memref<16x10xf32, #tpu.memory_space<vmem>>, vector<16x10xf32>,
    return
  }
  func.func @transform_0(%arg0: i32) -> (i32, i32) {
    %c0_i32 = arith.constant 0 : i32
    %c0_i32_0 = arith.constant 0 : i32
    %c0_i32_1 = arith.constant 0 : i32
    return %c0_i32, %c0_i32_0 : i32, i32
  }
  func.func @transform_1(%arg0: i32) -> (i32, i32) {
    %c0_i32 = arith.constant 0 : i32
    %c0_i32_0 = arith.constant 0 : i32
    %c0_i32_1 = arith.constant 0 : i32
    return %c0_i32, %c0_i32_0 : i32, i32
  }
  func.func @transform_2(%arg0: i32) -> (i32, i32) {
    %c0_i32 = arith.constant 0 : i32
    %c0_i32_0 = arith.constant 0 : i32
    %c0_i32_1 = arith.constant 0 : i32
    return %c0_i32, %c0_i32_0 : i32, i32
  }
  func.func @transform_3(%arg0: i32) -> (i32, i32) {
    %c0_i32 = arith.constant 0 : i32
    %c0_i32_0 = arith.constant 0 : i32
    %c0_i32_1 = arith.constant 0 : i32
    return %c0_i32, %c0_i32_0 : i32, i32
  }
  func.func @transform_4(%arg0: i32) -> (i32, i32) {
    %c0_i32 = arith.constant 0 : i32
    %c0_i32_0 = arith.constant 0 : i32
    %c0_i32_1 = arith.constant 0 : i32
    return %c0_i32, %c0_i32_0 : i32, i32
  }
  func.func @transform_5(%arg0: i32) -> (i32, i32) {
    %c0_i32 = arith.constant 0 : i32
    %c0_i32_0 = arith.constant 0 : i32
    %c0_i32_1 = arith.constant 0 : i32
    return %c0_i32, %c0_i32_0 : i32, i32
  }
  func.func @transform_6(%arg0: i32) -> (i32, i32) {
    %c0_i32 = arith.constant 0 : i32
    %c0_i32_0 = arith.constant 0 : i32
    %c0_i32_1 = arith.constant 0 : i32
    return %c0_i32, %c0_i32_0 : i32, i32
  }
  func.func @transform_7(%arg0: i32) -> (i32, i32) {
    %c0_i32 = arith.constant 0 : i32
    %c0_i32_0 = arith.constant 0 : i32
    %c0_i32_1 = arith.constant 0 : i32
    return %c0_i32, %c0_i32_0 : i32, i32
  }
  func.func @transform_8(%arg0: i32) -> (i32, i32) {
    %c0_i32 = arith.constant 0 : i32
    %c0_i32_0 = arith.constant 0 : i32
    %c0_i32_1 = arith.constant 0 : i32
    return %c0_i32, %c0_i32_0 : i32, i32
  }
  func.func @transform_9(%arg0: i32) -> (i32, i32) {
    %c0_i32 = arith.constant 0 : i32
    %c0_i32_0 = arith.constant 0 : i32
    %c0_i32_1 = arith.constant 0 : i32
    return %c0_i32, %c0_i32_0 : i32, i32
  }
  func.func @transform_10(%arg0: i32) -> (i32, i32) {
    %c0_i32 = arith.constant 0 : i32
    %c0_i32_0 = arith.constant 0 : i32
    %c0_i32_1 = arith.constant 0 : i32
    return %c0_i32, %c0_i32_0 : i32, i32
  }
  func.func @transform_11(%arg0: i32) -> (i32, i32) {
    %c0_i32 = arith.constant 0 : i32
    %c0_i32_0 = arith.constant 0 : i32
    %c0_i32_1 = arith.constant 0 : i32
    return %c0_i32, %c0_i32_0 : i32, i32
  }
  func.func @transform_12(%arg0: i32) -> (i32, i32) {
    %c0_i32 = arith.constant 0 : i32
    %c0_i32_0 = arith.constant 0 : i32
    %c0_i32_1 = arith.constant 0 : i32
    return %c0_i32, %c0_i32_0 : i32, i32
  }
  func.func @transform_13(%arg0: i32) -> (i32, i32) {
    %c0_i32 = arith.constant 0 : i32
    %c0_i32_0 = arith.constant 0 : i32
    %c0_i32_1 = arith.constant 0 : i32
    return %c0_i32, %c0_i32_0 : i32, i32
  }
  func.func @transform_14(%arg0: i32) -> (i32, i32) {
    %c0_i32 = arith.constant 0 : i32
    %c0_i32_0 = arith.constant 0 : i32
    %c0_i32_1 = arith.constant 0 : i32
    return %c0_i32, %c0_i32_0 : i32, i32
  }
  func.func @transform_15(%arg0: i32) -> (i32, i32) {
    %c0_i32 = arith.constant 0 : i32
    %c0_i32_0 = arith.constant 0 : i32
    %c0_i32_1 = arith.constant 0 : i32
    return %c0_i32, %c0_i32_0 : i32, i32
  }
  func.func @transform_16(%arg0: i32) -> (i32, i32) {
    %c0_i32 = arith.constant 0 : i32
    %c0_i32_0 = arith.constant 0 : i32
    %c0_i32_1 = arith.constant 0 : i32
    return %c0_i32, %c0_i32_0 : i32, i32
  }
  func.func @transform_17(%arg0: i32) -> (i32, i32) {
    %c0_i32 = arith.constant 0 : i32
    %c0_i32_0 = arith.constant 0 : i32
    %c0_i32_1 = arith.constant 0 : i32
    return %c0_i32, %c0_i32_0 : i32, i32
  }
  func.func @transform_18(%arg0: i32) -> (i32, i32) {
    %c0_i32 = arith.constant 0 : i32
    %c0_i32_0 = arith.constant 0 : i32
    %c0_i32_1 = arith.constant 0 : i32
    return %c0_i32, %c0_i32_0 : i32, i32
  }
  func.func @transform_19(%arg0: i32) -> (i32, i32) {
    %c0_i32 = arith.constant 0 : i32
    %c0_i32_0 = arith.constant 0 : i32
    %c0_i32_1 = arith.constant 0 : i32
    return %c0_i32, %c0_i32_0 : i32, i32
  }
}

</mosaic_0001>

<bundles_post_ra>
// kernel: tpu_custom_call.1
= control target key start
LH: loop header
LB: loop body
LE: loop exit
PB: predicated region body
PF: predicated region fallthrough
CT: control target
= control target key end

     0   :  { %s1601_s0 = inlined_call_operand.vmem [shape: bf16[16,16], index: 0, kind: input, shape index: {}]   ;;  %s1602_s1 = inlined_call_operand.vmem [shape: f32[16,8], index: 1, kind: input, shape index: {}]   ;;  %s1603_s2 = inlined_call_operand.vmem [shape: bf16[8,16], index: 2, kind: input, shape index: {}]   ;;  %s1604_s3 = inlined_call_operand.vmem [shape: bf16[2,16], index: 3, kind: input, shape index: {}]   ;;  %s1605_s4 = inlined_call_operand.vmem [shape: bf16[16,2], index: 4, kind: input, shape index: {}]   ;;  %s1606_s5 = inlined_call_operand.vmem [shape: f32[1,16], index: 5, kind: input, shape index: {}]   ;;  %s1607_s6 = inlined_call_operand.vmem [shape: bf16[16,16], index: 6, kind: input, shape index: {}]   ;;  %s1608_s7 = inlined_call_operand.vmem [shape: bf16[2,16], index: 7, kind: input, shape index: {}]   ;;  %s1609_s8 = inlined_call_operand.vmem [shape: bf16[16,2], index: 8, kind: input, shape index: {}]   ;;  %s1610_s9 = inlined_call_operand.vmem [shape: f32[1,16], index: 9, kind: input, shape index: {}]   ;;  %s1611_s10 = inlined_call_operand.vmem [shape: bf16[16,8], index: 10, kind: input, shape index: {}]   ;;  %s1612_s11 = inlined_call_operand.vmem [shape: f32[1,8], index: 11, kind: input, shape index: {}]   ;;  %s1613_s12 = inlined_call_operand.vmem [shape: bf16[8,4], index: 12, kind: input, shape index: {}]   ;;  %s1614_s13 = inlined_call_operand.vmem [shape: f32[1,4], index: 13, kind: input, shape index: {}]   ;;  %s1615_s14 = inlined_call_operand.vmem [shape: bf16[16,8], index: 14, kind: input, shape index: {}]   ;;  %s1616_s15 = inlined_call_operand.vmem [shape: f32[1,8], index: 15, kind: input, shape index: {}]   ;;  %s1617_s16 = inlined_call_operand.vmem [shape: bf16[8,6], index: 16, kind: input, shape index: {}]   ;;  %s1618_s17 = inlined_call_operand.vmem [shape: f32[1,6], index: 17, kind: input, shape index: {}]   ;;  %s1619_s18 = inlined_call_operand.hbm [shape: f32[16,16], index: 18, kind: output, shape index: {0}]   ;;  %s1620_s19 = inlined_call_operand.hbm [shape: f32[16,10], index: 19, kind: output, shape index: {1}]  }
   0x1   :  { %1622 = sst [smem:[#allocation8_spill]] %s1601_s0 }
   0x2   :  { %1623 = sst [smem:[#allocation9_spill]] %s1602_s1 }
   0x3   :  { %1624 = sst [smem:[#allocation10_spill]] %s1603_s2 }
   0x4   :  { %1625 = sst [smem:[#allocation11_spill]] %s1604_s3 }
   0x5   :  { %25 = vsyncpa [#allocation3], 0  ;;  %s1626_s20 = sld [smem:[#allocation10_spill]]  ;;  %vm76_vm0 = vcmask 1043456   ;;  %v1297_v2 = vmov 0.0   ;;  %vm1298_vm1 = vmmov 0  }
   0x6   :  { %s1627_s22 = sld [smem:[#allocation9_spill]]  ;;  %1124 = vmatprep.subr.bf16.mxu0 %v1297_v2  ;;  %1126 = vmatprep.mubr.msk.bf16.mxu0 %vm1298_vm1, %v1297_v2  ;;  %vm72_vm2 = vcmask 64512  }
   0x7   :  { %1130 = vmatprep.subr.bf16.mxu1 %v1297_v2  ;;  %1132 = vmatprep.mubr.msk.bf16.mxu1 %vm1298_vm1, %v1297_v2 }
   0xb   :  { %v71_v0 = vld [vmem:[%s1626_s20] sm:$0xf] }
   0xc   :  { %v68_v1 = vld [vmem:[%s1627_s22] sm:$0xff]  ;;  %v78_v3 = vsel %vm76_vm0, %v71_v0, 0  ;;  %v69_v4 = vld [vmem:[%s1627_s22 + $0x8] sm:$0xff] }
   0xd   :  { %1125 = vmatpush3.bf16.msra.mxu0 %v78_v3  ;;  %v70_v5 = vpack.c.bf16 %v69_v4, %v68_v1 }
   0xe   :  { %1136 = vmatprep.subr.bf16.mxu0 %v1297_v2 }
  0x10   :  { %1127 = vmatmul.mubr.msk.bf16.vlgmr.msra.gmra.mxu0 %vm72_vm2, %v70_v5 }
  0x11   :  { %26 = vsyncpa [#allocation5], 0  ;;  %1138 = vmatprep.mubr.msk.bf16.mxu0 %vm1298_vm1, %v1297_v2  ;;  %v1224_v6 = vld [vmem:[%s1605_s4] sm:$0xff]   ;;  %v1299_v7 = vmov 1   ;;  %v1300_v8 = vmov 0   ;;  %vm130_vm3 = vcmask 130048   ;;  %v229_v24 = vlaneseq }
  0x12   :  { %1131 = vmatpush3.bf16.msra.mxu1 %v1224_v6  ;;  %1218 = vset.pattern.permute.xlu0 %v1299_v7  ;;  %s1628_s26 = sld [smem:[#allocation11_spill]]  ;;  %s1301_s0 = smov 120  }
  0x13   :  { %1142 = vmatprep.subr.bf16.mxu1 %v1297_v2  ;;  %1219 = vset.pattern.permute.xlu1 %v1300_v8  ;;  %v1452_v25 = vshrl.u32 %v229_v24, 7  ;;  %s1629_s29 = sld [smem:[#allocation8_spill]]  ;;  %s1302_s22 = smov 8  }
  0x15   :  { %v231_v26 = vsub.s32 0, %v1452_v25  ;;  %v321_v27 = vsub.s32 1, %v1452_v25 }
  0x18   :  { %v175_v15 = vld [vmem:[%s1628_s26] sm:$0x1] }
  0x19   :  { %v1093_v30 = vld [vmem:[%s1629_s29] sm:$0xff]  }
  0x1a   :  { %v1463_v35 = vunpack.c.l.bf16 %v1093_v30  ;;  %v1466_v44 = vunpack.c.h.bf16 %v1093_v30 }
  0xd0   :  { %v114_v9 = vpop.f32.mrf.mxu0 }
  0xd2   :  { %v1128_v10 = vpop.f32.mrf.mxu0 }
  0xd4   :  { %v117_v11 = vpop.f32.mrf.mxu0 }
  0xd5   :  { %v1433_v12 = vpack.c.bf16 %v117_v11, %v114_v9 }
  0xd6   :  { %v1129_v13 = vpop.f32.mrf.mxu0 }
  0xd7   :  { %1133 = vmatmul.mubr.msk.bf16.vlgmr.msra.gmra.mxu1 %vm130_vm3, %v1433_v12  ;;  %v132_v14 = vsel %vm130_vm3, %v1433_v12, 0 }
  0xd8   :  { %1143 = vmatpush3.bf16.msra.mxu1 %v1433_v12  ;;  %1137 = vmatpush3.bf16.xpose.msra.mxu0 %v132_v14 }
  0xd9   :  { %1148 = vmatprep.subr.bf16.mxu0 %v1297_v2  ;;  %1144 = vmatprep.mubr.msk.bf16.mxu1 %vm1298_vm1, %v1297_v2 }
  0xda   :  { %1154 = vmatprep.subr.bf16.mxu1 %v1297_v2 }
  0xdf   :  { %1139 = vmatmul.mubr.msk.bf16.vlgmr.msra.gmra.mxu0 %vm130_vm3, %v175_v15 }
  0xe0   :  { %1150 = vmatprep.mubr.msk.bf16.mxu0 %vm1298_vm1, %v1297_v2 }
 0x197   :  { %v168_v16 = vpop.f32.mrf.mxu1 }
 0x198   :  { %221 = vperm.xlu1 %1219, %v168_v16   ;;  %312 = vperm.xlu0 %1218, %v168_v16  }
 0x199   :  { %v1134_v17 = vpop.f32.mrf.mxu1 }
 0x19b   :  { %v171_v18 = vpop.f32.mrf.mxu1 }
 0x19c   :  { %226 = vperm.xlu1 %1219, %v171_v18   ;;  %316 = vperm.xlu0 %1218, %v171_v18  }
 0x19d   :  { %v1135_v19 = vpop.f32.mrf.mxu1 }
 0x19f   :  { %v213_v20 = vpop.f32.mrf.mxu0 }
 0x1a0   :  { %1220 = vset.pattern.permute.xlu1 %v1299_v7  ;;  %1221 = vset.pattern.permute.xlu0 %v1300_v8  ;;  %v232_v28 = vrot.slane %v213_v20, %v231_v26  ;;  %v322_v29 = vrot.slane %v213_v20, %v321_v27 }
 0x1a1   :  { %v1140_v21 = vpop.f32.mrf.mxu0 }
 0x1a2   :  { %v1225_v21 = vld [vmem:[%s1607_s6] sm:$0xff]  }
 0x1a3   :  { %v216_v22 = vpop.f32.mrf.mxu0 }
 0x1a5   :  { %v1141_v23 = vpop.f32.mrf.mxu0 }
 0x213   :  { %v222_v31 = vpop.permute.xlu1 %221  ;;  %v313_v32 = vpop.permute.xlu0 %312 }
 0x214   :  { %v233_v33 = vadd.f32 %v232_v28, %v222_v31  ;;  %v323_v34 = vadd.f32 %v322_v29, %v313_v32 }
 0x216   :  { %vm325_vm4 = vcmp.gt.f32.partialorder %v323_v34, 0.0  ;;  %v327_v36 = vmul.f32 0.2, %v323_v34  ;;  %v237_v39 = vmul.f32 0.2, %v233_v33  ;;  %vm235_vm5 = vcmp.gt.f32.partialorder %v233_v33, 0.0 }
 0x217   :  { %v227_v37 = vpop.permute.xlu1 %226  ;;  %v317_v38 = vpop.permute.xlu0 %316 }
 0x218   :  { %v234_v40 = vadd.f32 %v232_v28, %v227_v37  ;;  %v324_v41 = vadd.f32 %v322_v29, %v317_v38  ;;  %v329_v42 = vsel %vm325_vm4, %v323_v34, %v327_v36  ;;  %v239_v49 = vsel %vm235_vm5, %v233_v33, %v237_v39  ;;  %v1226_v28 = vld [vmem:[%s1609_s8] sm:$0xff]  }
 0x219   :  { %v331_v43 = vadd.f32 %v1463_v35, %v329_v42  ;;  %v241_v52 = vadd.f32 %v1463_v35, %v239_v49 }
 0x21a   :  { %vm326_vm6 = vcmp.gt.f32.partialorder %v324_v41, 0.0  ;;  %v328_v45 = vmul.f32 0.2, %v324_v41  ;;  %v238_v47 = vmul.f32 0.2, %v234_v40  ;;  %vm236_vm7 = vcmp.gt.f32.partialorder %v234_v40, 0.0 }
 0x21b   :  { %v333_v46 = vsel %vm130_vm3, %v331_v43, -inf  ;;  %v243_v54 = vsel %vm130_vm3, %v241_v52, -inf }
 0x21c   :  { %334 = vmax.xlane.f32.xlu0 %v333_v46  ;;  %v330_v48 = vsel %vm326_vm6, %v324_v41, %v328_v45  ;;  %v240_v53 = vsel %vm236_vm7, %v234_v40, %v238_v47  ;;  %v1073_v45 = vld [vmem:[%s1606_s5] ss:$0 sm:$0xff] }
 0x21d   :  { %v332_v50 = vadd.f32 %v1466_v44, %v330_v48  ;;  %v242_v55 = vadd.f32 %v1466_v44, %v240_v53 }
 0x21f   :  { %v336_v51 = vsel %vm130_vm3, %v332_v50, -inf  ;;  %v246_v56 = vsel %vm130_vm3, %v242_v55, -inf }
 0x220   :  { %337 = vmax.xlane.f32.xlu1 %v336_v51 }
 0x224   :  { %244 = vmax.xlane.f32.xlu1 %v243_v54 }
 0x228   :  { %247 = vmax.xlane.f32.xlu1 %v246_v56 }
 0x232   :  { %354 = vrot.lane.b32.xlu0 %v1433_v12, %s1301_s0 }
 0x2a5   :  { %v335_v57 = vpop.xlane.xlu0 %334 }
 0x2a6   :  { %v339_v60 = vsub.f32 %v331_v43, %v335_v57 }
 0x2a9   :  { %v338_v58 = vpop.xlane.xlu1 %337  ;;  %v355_v59 = vpop.permute.xlu0 %354 }
 0x2aa   :  { %v340_v61 = vsub.f32 %v332_v50, %v338_v58  ;;  %1149 = vmatpush3.bf16.msra.mxu0 %v355_v59 }
 0x2ab   :  { %1160 = vmatprep.subr.bf16.mxu0 %v1297_v2 }
 0x2ac   :  { %v341_v62 = vpack.c.bf16 %v340_v61, %v339_v60 }
 0x2ad   :  { %v245_v63 = vpop.xlane.xlu1 %244 }
 0x2ae   :  { %v343_v0 = vmul.bf16 1069105081, %v341_v62  ;;  %v249_v3 = vsub.f32 %v241_v52, %v245_v63  ;;  %v532_v62 = vld [vmem:[%s1608_s7] sm:$0x1] }
 0x2b0   :  { %1229 = vpow.bf16 %v343_v0 }
 0x2b1   :  { %v248_v1 = vpop.xlane.xlu1 %247 }
 0x2b2   :  { %v250_v4 = vsub.f32 %v242_v55, %v248_v1 }
 0x2b4   :  { %v251_v5 = vpack.c.bf16 %v250_v4, %v249_v3 }
 0x2b6   :  { %v253_v6 = vmul.bf16 1069105081, %v251_v5 }
 0x2b8   :  { %1231 = vpow.bf16 %v253_v6 }
 0x2be   :  { %v1230_v9 = vpop.eup %1229 }
 0x2bf   :  { %1151 = vmatmul.mubr.msk.bf16.vlgmr.msra.gmra.mxu0 %vm130_vm3, %v1230_v9  ;;  %v345_v10 = vunpack.c.l.bf16 %v1230_v9  ;;  %v346_v12 = vunpack.c.h.bf16 %v1230_v9 }
 0x2c0   :  { %1162 = vmatprep.mubr.msk.bf16.mxu0 %vm1298_vm1, %v1297_v2  ;;  %1161 = vmatpush3.bf16.msra.mxu0 %v1226_v28 }
 0x2c1   :  { %v347_v11 = vsel %vm130_vm3, %v345_v10, 0.0  ;;  %v350_v13 = vsel %vm130_vm3, %v346_v12, 0.0  ;;  %1172 = vmatprep.subr.bf16.mxu0 %v1297_v2 }
 0x2c2   :  { %348 = vadd.xlane.f32.xlu1 %v347_v11 }
 0x2c6   :  { %v1232_v14 = vpop.eup %1231  ;;  %351 = vadd.xlane.f32.xlu1 %v350_v13 }
 0x2c7   :  { %1145 = vmatmul.mubr.msk.bf16.vlgmr.msra.gmra.mxu1 %vm130_vm3, %v1232_v14  ;;  %v256_v15 = vunpack.c.h.bf16 %v1232_v14  ;;  %v255_v16 = vunpack.c.l.bf16 %v1232_v14 }
 0x2c8   :  { %1156 = vmatprep.mubr.msk.bf16.mxu1 %vm1298_vm1, %v1297_v2  ;;  %1155 = vmatpush3.bf16.msra.mxu1 %v1225_v21 }
 0x2c9   :  { %v260_v17 = vsel %vm130_vm3, %v256_v15, 0.0  ;;  %v257_v18 = vsel %vm130_vm3, %v255_v16, 0.0  ;;  %1166 = vmatprep.subr.bf16.mxu1 %v1297_v2 }
 0x2ca   :  { %261 = vadd.xlane.f32.xlu0 %v260_v17  ;;  %258 = vadd.xlane.f32.xlu1 %v257_v18 }
 0x34b   :  { %v349_v19 = vpop.xlane.xlu1 %348 }
 0x34c   :  { %1233 = vrcp.f32 %v349_v19 }
 0x34f   :  { %v352_v20 = vpop.xlane.xlu1 %351 }
 0x350   :  { %1235 = vrcp.f32 %v352_v20 }
 0x353   :  { %v259_v39 = vpop.xlane.xlu1 %258  ;;  %v262_v40 = vpop.xlane.xlu0 %261 }
 0x354   :  { %1237 = vrcp.f32 %v259_v39 }
 0x355   :  { %1239 = vrcp.f32 %v262_v40 }
 0x359   :  { %v1234_v22 = vpop.eup %1233 }
 0x35d   :  { %v1236_v30 = vpop.eup %1235 }
 0x361   :  { %v1238_v41 = vpop.eup %1237 }
 0x362   :  { %v1240_v47 = vpop.eup %1239 }
 0x37f   :  { %v394_v23 = vpop.f32.mrf.mxu0 }
 0x380   :  { %v403_v24 = vmul.f32 %v1234_v22, %v394_v23 }
 0x381   :  { %v1152_v29 = vpop.f32.mrf.mxu0 }
 0x382   :  { %407 = vrot.lane.b32.xlu1 %v403_v24, %s1302_s22 }
 0x383   :  { %v397_v31 = vpop.f32.mrf.mxu0 }
 0x384   :  { %v404_v32 = vmul.f32 %v1236_v30, %v397_v31 }
 0x385   :  { %v1153_v33 = vpop.f32.mrf.mxu0 }
 0x386   :  { %409 = vrot.lane.b32.xlu1 %v404_v32, %s1302_s22 }
 0x387   :  { %v300_v34 = vpop.f32.mrf.mxu1 }
 0x388   :  { %v309_v42 = vmul.f32 %v1238_v41, %v300_v34 }
 0x389   :  { %v1146_v36 = vpop.f32.mrf.mxu1 }
 0x38b   :  { %v303_v37 = vpop.f32.mrf.mxu1 }
 0x38c   :  { %v310_v48 = vmul.f32 %v1240_v47, %v303_v37 }
 0x38d   :  { %v1147_v38 = vpop.f32.mrf.mxu1 }
 0x3f4   :  { %v408_v43 = vpop.permute.xlu1 %407 }
 0x3f5   :  { %v413_v46 = vsel %vm72_vm2, %v309_v42, %v408_v43 }
 0x3f6   :  { %v422_v49 = vadd.f32 %v1073_v45, %v413_v46 }
 0x3f8   :  { %v410_v50 = vpop.permute.xlu1 %409  ;;  %v424_v53 = vmax.f32 %v422_v49, 0.0 }
 0x3f9   :  { %v414_v51 = vsel %vm72_vm2, %v310_v48, %v410_v50 }
 0x3fa   :  { %v423_v52 = vadd.f32 %v1073_v45, %v414_v51 }
 0x3fc   :  { %v425_v54 = vmax.f32 %v423_v52, 0.0 }
 0x3fe   :  { %v426_v55 = vpack.c.bf16 %v425_v54, %v424_v53 }
 0x400   :  { %1157 = vmatmul.mubr.msk.bf16.vlgmr.msra.gmra.mxu1 %vm130_vm3, %v426_v55 }
 0x401   :  { %1168 = vmatprep.mubr.msk.bf16.mxu1 %vm1298_vm1, %v1297_v2 }
 0x4c0   :  { %v472_v56 = vpop.f32.mrf.mxu1 }
 0x4c2   :  { %v1158_v57 = vpop.f32.mrf.mxu1 }
 0x4c4   :  { %v475_v58 = vpop.f32.mrf.mxu1 }
 0x4c5   :  { %v479_v59 = vpack.c.bf16 %v475_v58, %v472_v56 }
 0x4c6   :  { %v1159_v60 = vpop.f32.mrf.mxu1 }
 0x4c7   :  { %1163 = vmatmul.mubr.msk.bf16.vlgmr.msra.gmra.mxu0 %vm130_vm3, %v479_v59  ;;  %v489_v61 = vsel %vm130_vm3, %v479_v59, 0 }
 0x4c8   :  { %1173 = vmatpush3.bf16.msra.mxu0 %v479_v59  ;;  %1167 = vmatpush3.bf16.xpose.msra.mxu1 %v489_v61 }
 0x4c9   :  { %1178 = vmatprep.subr.bf16.mxu1 %v1297_v2  ;;  %1174 = vmatprep.mubr.msk.bf16.mxu0 %vm1298_vm1, %v1297_v2 }
 0x4ca   :  { %1184 = vmatprep.subr.bf16.mxu0 %v1297_v2 }
 0x4cf   :  { %1169 = vmatmul.mubr.msk.bf16.vlgmr.msra.gmra.mxu1 %vm130_vm3, %v532_v62 }
 0x4d0   :  { %1180 = vmatprep.mubr.msk.bf16.mxu1 %vm1298_vm1, %v1297_v2 }
 0x587   :  { %v525_v63 = vpop.f32.mrf.mxu0 }
 0x588   :  { %578 = vperm.xlu0 %1221, %v525_v63   ;;  %669 = vperm.xlu1 %1220, %v525_v63  }
 0x589   :  { %v1164_v0 = vpop.f32.mrf.mxu0 }
 0x58b   :  { %v528_v1 = vpop.f32.mrf.mxu0 }
 0x58c   :  { %711 = vrot.lane.b32.xlu0 %v479_v59, %s1301_s0  ;;  %673 = vperm.xlu1 %1220, %v528_v1   ;;  %v1227_v59 = vld [vmem:[%s1611_s10] sm:$0xff]  }
 0x58d   :  { %v1165_v3 = vpop.f32.mrf.mxu0  ;;  %1223 = vset.pattern.permute.xlu0 %v1299_v7 }
 0x58f   :  { %v570_v4 = vpop.f32.mrf.mxu1 }
 0x590   :  { %1222 = vset.pattern.permute.xlu1 %v1300_v8  ;;  %v589_v10 = vrot.slane %v570_v4, %v231_v26  ;;  %v679_v11 = vrot.slane %v570_v4, %v321_v27 }
 0x591   :  { %583 = vperm.xlu1 %1222, %v528_v1   ;;  %v1170_v5 = vpop.f32.mrf.mxu1 }
 0x593   :  { %v573_v6 = vpop.f32.mrf.mxu1 }
 0x595   :  { %v1171_v9 = vpop.f32.mrf.mxu1 }
 0x603   :  { %v579_v12 = vpop.permute.xlu0 %578  ;;  %v670_v13 = vpop.permute.xlu1 %669 }
 0x604   :  { %v590_v14 = vadd.f32 %v589_v10, %v579_v12  ;;  %v680_v15 = vadd.f32 %v679_v11, %v670_v13 }
 0x606   :  { %vm682_vm8 = vcmp.gt.f32.partialorder %v680_v15, 0.0  ;;  %v684_v16 = vmul.f32 0.2, %v680_v15  ;;  %v594_v18 = vmul.f32 0.2, %v590_v14  ;;  %vm592_vm9 = vcmp.gt.f32.partialorder %v590_v14, 0.0 }
 0x607   :  { %v712_v7 = vpop.permute.xlu0 %711  ;;  %v674_v17 = vpop.permute.xlu1 %673 }
 0x608   :  { %v681_v8 = vadd.f32 %v679_v11, %v674_v17  ;;  %1179 = vmatpush3.bf16.msra.mxu1 %v712_v7  ;;  %v686_v19 = vsel %vm682_vm8, %v680_v15, %v684_v16  ;;  %v596_v22 = vsel %vm592_vm9, %v590_v14, %v594_v18  ;;  %v1081_v15 = vld [vmem:[%s1610_s9] ss:$0 sm:$0xff] }
 0x609   :  { %v688_v20 = vadd.f32 %v1463_v35, %v686_v19  ;;  %1190 = vmatprep.subr.bf16.mxu1 %v1297_v2  ;;  %v598_v30 = vadd.f32 %v1463_v35, %v596_v22 }
 0x60a   :  { %vm683_vm10 = vcmp.gt.f32.partialorder %v681_v8, 0.0  ;;  %v685_v25 = vmul.f32 0.2, %v681_v8 }
 0x60b   :  { %v690_v26 = vsel %vm130_vm3, %v688_v20, -inf  ;;  %v600_v33 = vsel %vm130_vm3, %v598_v30, -inf }
 0x60c   :  { %v584_v27 = vpop.permute.xlu1 %583  ;;  %691 = vmax.xlane.f32.xlu1 %v690_v26  ;;  %v687_v21 = vsel %vm683_vm10, %v681_v8, %v685_v25 }
 0x60d   :  { %v591_v23 = vadd.f32 %v589_v10, %v584_v27  ;;  %v689_v24 = vadd.f32 %v1466_v44, %v687_v21  ;;  %v1228_v21 = vld [vmem:[%s1615_s14] sm:$0xff]  }
 0x60f   :  { %vm593_vm11 = vcmp.gt.f32.partialorder %v591_v23, 0.0  ;;  %v595_v28 = vmul.f32 0.2, %v591_v23  ;;  %v693_v29 = vsel %vm130_vm3, %v689_v24, -inf }
 0x610   :  { %694 = vmax.xlane.f32.xlu1 %v693_v29 }
 0x611   :  { %v597_v31 = vsel %vm593_vm11, %v591_v23, %v595_v28  ;;  %v847_v23 = vld [vmem:[%s1613_s12] sm:$0xf] }
 0x612   :  { %v599_v32 = vadd.f32 %v1466_v44, %v597_v31  ;;  %v1082_v28 = vld [vmem:[%s1612_s11] ss:$0 sm:$0xff]  ;;  %s1303_s11 = smov [#allocation2]  }
 0x614   :  { %601 = vmax.xlane.f32.xlu1 %v600_v33  ;;  %v603_v34 = vsel %vm130_vm3, %v599_v32, -inf }
 0x615   :  { %604 = vmax.xlane.f32.xlu0 %v603_v34 }
 0x695   :  { %v692_v36 = vpop.xlane.xlu1 %691 }
 0x696   :  { %v696_v38 = vsub.f32 %v688_v20, %v692_v36  ;;  %v963_v36 = vld [vmem:[%s1617_s16] sm:$0xf] }
 0x699   :  { %v695_v37 = vpop.xlane.xlu1 %694 }
 0x69a   :  { %v697_v39 = vsub.f32 %v689_v24, %v695_v37  ;;  %v860_v24 = vsel %vm76_vm0, %v847_v23, 0 }
 0x69c   :  { %v698_v40 = vpack.c.bf16 %v697_v39, %v696_v38  ;;  %v1087_v39 = vld [vmem:[%s1616_s15] ss:$0 sm:$0xff]  ;;  %s1040_s15 = sshll.u32 %s1303_s11, 4  ;;  %s1041_s15 = int_to_ptr.vmem [resolvable:$true] %s1040_s15 }
 0x69d   :  { %v602_v41 = vpop.xlane.xlu1 %601  ;;  %s1253_s30 = scalar_lea.vmem %s1041_s15, 256  ;;  %p1258_p1 = scmp.lt.s32.totalorder %s1041_s15, %s1041_s15 }
 0x69e   :  { %v700_v42 = vmul.bf16 1069105081, %v698_v40  ;;  %v606_v43 = vsub.f32 %v598_v30, %v602_v41  ;;  %v605_v45 = vpop.xlane.xlu0 %604  ;;  %p1254_p0 = scmp.ne.s32.totalorder %s1041_s15, %s1253_s30  ;;  %p1259_p2 = scmp.lt.s32.totalorder %s1253_s30, %s1253_s30 }
 0x69f   :  { %v607_v35 = vsub.f32 %v599_v32, %v605_v45 }
 0x6a0   :  { %1241 = vpow.bf16 %v700_v42  ;;  %v976_v42 = vsel %vm76_vm0, %v963_v36, 0  ;;  %p1260_p3 = por %p1259_p2, %p1258_p1 }
 0x6a1   :  { %v608_v46 = vpack.c.bf16 %v607_v35, %v606_v43 }
 0x6a2   :  { %p1261_p4 = pnand %p1260_p3, %p1254_p0 }
 0x6a3   :  { %v610_v47 = vmul.bf16 1069105081, %v608_v46 }
 0x6a5   :  { %1243 = vpow.bf16 %v610_v47 }
 0x6ae   :  { %v1242_v44 = vpop.eup %1241 }
 0x6af   :  { %1181 = vmatmul.mubr.msk.bf16.vlgmr.msra.gmra.mxu1 %vm130_vm3, %v1242_v44  ;;  %v702_v48 = vunpack.c.l.bf16 %v1242_v44  ;;  %v703_v50 = vunpack.c.h.bf16 %v1242_v44 }
 0x6b0   :  { %1192 = vmatprep.mubr.msk.bf16.mxu1 %vm1298_vm1, %v1297_v2  ;;  %1191 = vmatpush3.bf16.msra.mxu1 %v860_v24 }
 0x6b1   :  { %v704_v49 = vsel %vm130_vm3, %v702_v48, 0.0  ;;  %v707_v52 = vsel %vm130_vm3, %v703_v50, 0.0  ;;  %1202 = vmatprep.subr.bf16.mxu1 %v1297_v2 }
 0x6b2   :  { %705 = vadd.xlane.f32.xlu1 %v704_v49 }
 0x6b3   :  { %v1244_v51 = vpop.eup %1243 }
 0x6b4   :  { %1175 = vmatmul.mubr.msk.bf16.vlgmr.msra.gmra.mxu0 %vm130_vm3, %v1244_v51  ;;  %v612_v53 = vunpack.c.l.bf16 %v1244_v51  ;;  %v613_v55 = vunpack.c.h.bf16 %v1244_v51 }
 0x6b5   :  { %1186 = vmatprep.mubr.msk.bf16.mxu0 %vm1298_vm1, %v1297_v2  ;;  %1185 = vmatpush3.bf16.msra.mxu0 %v1227_v59 }
 0x6b6   :  { %708 = vadd.xlane.f32.xlu1 %v707_v52  ;;  %v614_v54 = vsel %vm130_vm3, %v612_v53, 0.0  ;;  %v617_v56 = vsel %vm130_vm3, %v613_v55, 0.0  ;;  %1196 = vmatprep.subr.bf16.mxu0 %v1297_v2 }
 0x6ba   :  { %615 = vadd.xlane.f32.xlu1 %v614_v54  ;;  %v1090_v54 = vld [vmem:[%s1618_s17] ss:$0 sm:$0xff] }
 0x6be   :  { %618 = vadd.xlane.f32.xlu1 %v617_v56 }
 0x73b   :  { %v706_v57 = vpop.xlane.xlu1 %705 }
 0x73c   :  { %1245 = vrcp.f32 %v706_v57 }
 0x73f   :  { %v709_v58 = vpop.xlane.xlu1 %708 }
 0x740   :  { %1247 = vrcp.f32 %v709_v58 }
 0x743   :  { %v616_v11 = vpop.xlane.xlu1 %615 }
 0x744   :  { %1249 = vrcp.f32 %v616_v11 }
 0x747   :  { %v619_v12 = vpop.xlane.xlu1 %618 }
 0x748   :  { %1251 = vrcp.f32 %v619_v12 }
 0x749   :  { %v1246_v60 = vpop.eup %1245 }
 0x74d   :  { %v1248_v0 = vpop.eup %1247 }
 0x751   :  { %v1250_v13 = vpop.eup %1249 }
 0x755   :  { %v1252_v17 = vpop.eup %1251 }
 0x76f   :  { %v751_v61 = vpop.f32.mrf.mxu1 }
 0x770   :  { %v760_v62 = vmul.f32 %v1246_v60, %v751_v61 }
 0x771   :  { %v1182_v63 = vpop.f32.mrf.mxu1 }
 0x772   :  { %764 = vrot.lane.b32.xlu1 %v760_v62, %s1302_s22 }
 0x773   :  { %v754_v1 = vpop.f32.mrf.mxu1 }
 0x774   :  { %v761_v3 = vmul.f32 %v1248_v0, %v754_v1  ;;  %v657_v4 = vpop.f32.mrf.mxu0 }
 0x775   :  { %v1183_v5 = vpop.f32.mrf.mxu1  ;;  %v666_v14 = vmul.f32 %v1250_v13, %v657_v4 }
 0x776   :  { %v1176_v6 = vpop.f32.mrf.mxu0  ;;  %766 = vrot.lane.b32.xlu0 %v761_v3, %s1302_s22 }
 0x778   :  { %v660_v9 = vpop.f32.mrf.mxu0 }
 0x779   :  { %v667_v8 = vmul.f32 %v1252_v17, %v660_v9 }
 0x77a   :  { %v1177_v10 = vpop.f32.mrf.mxu0 }
 0x7e4   :  { %v765_v16 = vpop.permute.xlu1 %764 }
 0x7e5   :  { %v770_v7 = vsel %vm72_vm2, %v666_v14, %v765_v16 }
 0x7e6   :  { %v779_v18 = vadd.f32 %v1081_v15, %v770_v7 }
 0x7e8   :  { %v781_v19 = vmax.f32 %v779_v18, 0.0  ;;  %v767_v20 = vpop.permute.xlu0 %766 }
 0x7e9   :  { %v771_v25 = vsel %vm72_vm2, %v667_v8, %v767_v20 }
 0x7ea   :  { %783 = vst.msk [vmem:[#allocation2] sm:$0xff] %vm130_vm3, %v781_v19  ;;  %v780_v26 = vadd.f32 %v1081_v15, %v771_v25 }
 0x7ec   :  { %v782_v27 = vmax.f32 %v780_v26, 0.0 }
 0x7ee   :  { %784 = vst.msk [vmem:[#allocation2 + $0x8] sm:$0xff] %vm130_vm3, %v782_v27  ;;  %v788_v22 = vpack.c.bf16 %v782_v27, %v781_v19 }
 0x7f0   :  { %1187 = vmatmul.mubr.msk.bf16.vlgmr.msra.gmra.mxu0 %vm130_vm3, %v788_v22 }
 0x7f1   :  { %1197 = vmatpush3.bf16.msra.mxu0 %v1228_v21  ;;  %1198 = vmatprep.mubr.msk.bf16.mxu0 %vm1298_vm1, %v1297_v2 }
 0x7f8   :  { %1199 = vmatmul.mubr.msk.bf16.vlgmr.msra.gmra.mxu0 %vm130_vm3, %v788_v22 }
 0x8b0   :  { %v838_v29 = vpop.f32.mrf.mxu0 }
 0x8b1   :  { %v839_v31 = vadd.f32 %v1082_v28, %v838_v29 }
 0x8b2   :  { %v1188_v30 = vpop.f32.mrf.mxu0 }
 0x8b3   :  { %v845_v37 = vmax.f32 %v839_v31, 0.0 }
 0x8b4   :  { %v841_v32 = vpop.f32.mrf.mxu0 }
 0x8b5   :  { %v842_v33 = vadd.f32 %v1082_v28, %v841_v32 }
 0x8b6   :  { %v1189_v34 = vpop.f32.mrf.mxu0 }
 0x8b7   :  { %v846_v38 = vmax.f32 %v842_v33, 0.0 }
 0x8b8   :  { %v954_v40 = vpop.f32.mrf.mxu0 }
 0x8b9   :  { %v849_v41 = vpack.c.bf16 %v846_v38, %v845_v37  ;;  %v955_v45 = vadd.f32 %v1087_v39, %v954_v40 }
 0x8ba   :  { %v1200_v43 = vpop.f32.mrf.mxu0 }
 0x8bb   :  { %1193 = vmatmul.mubr.msk.bf16.vlgmr.msra.gmra.mxu1 %vm72_vm2, %v849_v41  ;;  %v961_v44 = vmax.f32 %v955_v45, 0.0 }
 0x8bc   :  { %1203 = vmatpush3.bf16.msra.mxu1 %v976_v42  ;;  %v957_v35 = vpop.f32.mrf.mxu0  ;;  %1204 = vmatprep.mubr.msk.bf16.mxu1 %vm1298_vm1, %v1297_v2 }
 0x8bd   :  { %v958_v46 = vadd.f32 %v1087_v39, %v957_v35 }
 0x8be   :  { %v1201_v47 = vpop.f32.mrf.mxu0 }
 0x8bf   :  { %v962_v48 = vmax.f32 %v958_v46, 0.0 }
 0x8c1   :  { %v965_v49 = vpack.c.bf16 %v962_v48, %v961_v44 }
 0x8c3   :  { %1205 = vmatmul.mubr.msk.bf16.vlgmr.msra.gmra.mxu1 %vm72_vm2, %v965_v49 }
 0x97b   :  { %v896_v50 = vpop.f32.mrf.mxu1 }
 0x97d   :  { %v1194_v51 = vpop.f32.mrf.mxu1 }
 0x97f   :  { %v899_v52 = vpop.f32.mrf.mxu1 }
 0x981   :  { %v1195_v53 = vpop.f32.mrf.mxu1 }
 0x982   :  { %1264 = shalt.err (!%p1261_p4)
}
 0x983   :  { %s1304_s20 = smov 128   ;;  %v1012_v2 = vpop.f32.mrf.mxu1  ;;  %s1305_s17 = smov 4   ;;  %v1085_v62 = vld [vmem:[%s1614_s13] ss:$0 sm:$0xff]  ;;  %vm1029_vm12 = vcmask 31744   ;;  %vm1032_vm13 = vcmask 80896  }
 0x984   :  { %1046 = dma.vmem_to_hbm [thread:$0]  %s1041_s15, 256, %s1619_s18, [#allocation3], %s1304_s20, %s1304_s20, %s1302_s22   ;;  %v1013_v55 = vadd.f32 %v1090_v54, %v1012_v2  ;;  %v897_v63 = vadd.f32 %v1085_v62, %v896_v50  ;;  %v900_v1 = vadd.f32 %v1085_v62, %v899_v52 }
 0x985   :  { %v1206_v56 = vpop.f32.mrf.mxu1  ;;  %s1306_s18 = smov [#allocation4]  }
 0x986   :  { %v1019_v57 = vmax.f32 %v1013_v55, 0.0  ;;  %v903_v0 = vmax.f32 %v897_v63, 0.0  ;;  %s1052_s5 = sshll.u32 %s1306_s18, 4  ;;  %v904_v5 = vmax.f32 %v900_v1, 0.0  ;;  %s1053_s5 = int_to_ptr.vmem [resolvable:$true] %s1052_s5 }
 0x987   :  { %v1015_v58 = vpop.f32.mrf.mxu1  ;;  %s1273_s2 = scalar_lea.vmem %s1053_s5, 256  ;;  %p1278_p6 = scmp.lt.s32.totalorder %s1053_s5, %s1053_s5 }
 0x988   :  { %v1016_v59 = vadd.f32 %v1090_v54, %v1015_v58  ;;  %1023 = vrot.lane.b32.xlu1 %v1019_v57, %s1305_s17  ;;  %p1274_p5 = scmp.ne.s32.totalorder %s1053_s5, %s1273_s2  ;;  %p1279_p7 = scmp.lt.s32.totalorder %s1273_s2, %s1273_s2 }
 0x989   :  { %v1207_v60 = vpop.f32.mrf.mxu1 }
 0x98a   :  { %v1020_v61 = vmax.f32 %v1016_v59, 0.0  ;;  %p1280_p8 = por %p1279_p7, %p1278_p6 }
 0x98c   :  { %1025 = vrot.lane.b32.xlu1 %v1020_v61, %s1305_s17  ;;  %p1281_p9 = pnand %p1280_p8, %p1274_p5 }
 0x9fa   :  { %v1024_v3 = vpop.permute.xlu1 %1023 }
 0x9fb   :  { %v1030_v4 = vsel %vm1029_vm12, %v903_v0, %v1024_v3 }
 0x9fc   :  { %1033 = vst.msk [vmem:[#allocation4] sm:$0xff] %vm1032_vm13, %v1030_v4 }
 0x9fe   :  { %v1026_v6 = vpop.permute.xlu1 %1025 }
 0x9ff   :  { %v1031_v9 = vsel %vm1029_vm12, %v904_v5, %v1026_v6 }
 0xa00   :  { %1034 = vst.msk [vmem:[#allocation4 + $0x8] sm:$0xff] %vm1032_vm13, %v1031_v9 }
 0xa01   :  { %1284 = shalt.err (!%p1281_p9)
}
 0xa02   :  { %1058 = dma.vmem_to_hbm [thread:$0]  %s1053_s5, 256, %s1620_s19, [#allocation5], %s1304_s20, %s1304_s20, %s1302_s22  }
 0xa03   :  { %1293 = dma.done.wait [#allocation3], 256  }
 0xa04   :  { %1294 = vsyncadd [#allocation3], 4294967040 }
 0xa05   :  { %1295 = dma.done.wait [#allocation5], 256  }
 0xa06   :  { %1296 = vsyncadd [#allocation5], 4294967040 }
 0xa07   :  { %1065 = vsyncpa [#allocation3], 1 }
 0xa08   :  { %1066 = vsyncpa [#allocation5], 1 }

</bundles_post_ra>
